<compile_context>
chip_gen: v7x
topology: tpu7x:2x2x1
jax: 0.10.0
libtpu: 0.0.40
codegen_flags: <defaults>
</compile_context>

<pallas_src>
import jax
import jax.numpy as jnp
from jax.experimental import pallas as pl
from jax.experimental.pallas import tpu as pltpu


def _mha_head_kernel(x_ref, wq_ref, wk_ref, wv_ref, wp_ref, bp_ref, out_ref):
    h = pl.program_id(1)

    x = x_ref[0]                           # (T, C) bf16 -- this batch row
    T, C = x.shape

    wq = wq_ref[h]                         # (C, hs) bf16, 1/sqrt(C) pre-folded
    wk = wk_ref[h]                         # (C, hs)
    wv = wv_ref[h]                         # (C, hs)
    wp = wp_ref[h]                         # (hs, C) -- this head's proj rows

    # Per-head projections: bf16 MXU operands, fp32 accumulation, immediate
    # bf16 result (fp32 values are never used elementwise).
    q = jnp.dot(x, wq, preferred_element_type=jnp.float32).astype(jnp.bfloat16)
    k = jnp.dot(x, wk, preferred_element_type=jnp.float32).astype(jnp.bfloat16)
    v = jnp.dot(x, wv, preferred_element_type=jnp.float32).astype(jnp.bfloat16)

    # Scores q @ k^T (contract head dim on both sides; no explicit transpose).
    s = jax.lax.dot_general(
        q, k, dimension_numbers=(((1,), (1,)), ((), ())),
        preferred_element_type=jnp.float32)                        # (T, T) f32

    # Causal mask (lower triangular); large finite negative for NaN safety.
    row = jax.lax.broadcasted_iota(jnp.int32, (T, T), 0)
    col = jax.lax.broadcasted_iota(jnp.int32, (T, T), 1)
    s = jnp.where(row >= col, s, -1e30)

    # Unnormalized softmax; normalization is applied after the PV matmul so we
    # scale (T, hs) instead of (T, T).
    s = s - jnp.max(s, axis=-1, keepdims=True)
    p = jnp.exp(s)                                                  # (T, T) f32
    l = jnp.sum(p, axis=-1, keepdims=True)                          # (T, 1)  f32

    o = jnp.dot(p.astype(jnp.bfloat16), v,
                preferred_element_type=jnp.float32)                 # (T, hs)
    o = o * pl.reciprocal(l, approx=True)                           # softmax denom

    # Rank-hs update: this head's contribution to the output projection.
    contrib = jnp.dot(o.astype(jnp.bfloat16), wp,
                      preferred_element_type=jnp.float32)           # (T, C)

    @pl.when(h == 0)
    def _init():
        out_ref[0] = jnp.broadcast_to(bp_ref[...], (T, C)).astype(out_ref.dtype)

    out_ref[0] += contrib


def multihead_attention(x, wq, wk, wv, wproj, bproj, *, n_heads):
    """x: (B, T, C) fp32. wq/wk/wv/wproj stored (in, out); bproj (C,). Returns (B, T, C) fp32."""
    B, T, C = x.shape
    assert C % n_heads == 0
    hs = C // n_heads

    scale = 1.0 / (C ** 0.5)   # matches the PyTorch module: / sqrt(embed_dim)

    # One-time per-head weight re-layout outside the kernel (cheap, XLA):
    #   (C, C) -> (H, C, hs) for QKV columns,  (C, C) -> (H, hs, C) for proj rows.
    def per_head_cols(w):
        return w.reshape(C, n_heads, hs).transpose(1, 0, 2).astype(jnp.bfloat16)

    wq_h = per_head_cols(wq * scale)   # fold the 1/sqrt(C) scale into Wq
    wk_h = per_head_cols(wk)
    wv_h = per_head_cols(wv)
    wp_h = wproj.reshape(n_heads, hs, C).astype(jnp.bfloat16)
    bias2d = bproj.reshape(1, C).astype(jnp.float32)
    x_bf = x.astype(jnp.bfloat16)

    # Explicit VMEM budget from the actual block sizes (+2x headroom).
    bf16, f32 = 2, 4
    est = (4 * C * C * bf16            # resident Wq/Wk/Wv/Wproj
           + 2 * T * C * bf16          # x block (double-buffered)
           + 2 * T * C * f32           # out block (double-buffered)
           + C * f32                   # bias
           + 2 * T * T * f32           # s, p intermediates
           + 8 * T * hs * f32)         # q/k/v/o and friends
    vmem_limit = int(min(100 * 2**20, max(2 * est, 16 * 2**20)))

    return pl.pallas_call(
        _mha_head_kernel,
        out_shape=jax.ShapeDtypeStruct((B, T, C), jnp.float32),
        grid=(B, n_heads),
        in_specs=[
            pl.BlockSpec((1, T, C), lambda b, h: (b, 0, 0)),         # x (resident across h)
            pl.BlockSpec((n_heads, C, hs), lambda b, h: (0, 0, 0)),  # Wq (all heads, resident)
            pl.BlockSpec((n_heads, C, hs), lambda b, h: (0, 0, 0)),  # Wk (resident)
            pl.BlockSpec((n_heads, C, hs), lambda b, h: (0, 0, 0)),  # Wv (resident)
            pl.BlockSpec((n_heads, hs, C), lambda b, h: (0, 0, 0)),  # Wproj (resident)
            pl.BlockSpec((1, C), lambda b, h: (0, 0)),               # proj bias
        ],
        # Same block index for every h => output stays resident and accumulates.
        out_specs=pl.BlockSpec((1, T, C), lambda b, h: (b, 0, 0)),
        compiler_params=pltpu.CompilerParams(
            dimension_semantics=("parallel", "arbitrary"),
            vmem_limit_bytes=vmem_limit),
    )(x_bf, wq_h, wk_h, wv_h, wp_h, bias2d)


def _reference(x, wq, wk, wv, wproj, bproj, *, n_heads):
    # Pure-JAX fp32 reference mirroring the PyTorch module semantics.
    B, T, C = x.shape
    hs = C // n_heads
    q = x @ wq
    k = x @ wk
    v = x @ wv
    mask = jnp.tril(jnp.ones((T, T)))
    outs = []
    for h in range(n_heads):
        qh = q[..., h * hs:(h + 1) * hs]
        kh = k[..., h * hs:(h + 1) * hs]
        vh = v[..., h * hs:(h + 1) * hs]
        wei = qh @ jnp.swapaxes(kh, -2, -1) / (C ** 0.5)
        wei = jnp.where(mask == 0, -jnp.inf, wei)
        wei = jax.nn.softmax(wei, axis=-1)
        outs.append(wei @ vh)
    cat = jnp.concatenate(outs, axis=-1)
    return cat @ wproj + bproj


if __name__ == "__main__":
    B, T, C, n_heads = 2, 8, 32, 4

    key = jax.random.PRNGKey(0)
    kx, kq, kk, kv, kp, kb = jax.random.split(key, 6)
    x = jax.random.normal(kx, (B, T, C), dtype=jnp.float32)
    # Deterministic synthetic parameters (stored (in, out); equivalent math to nn.Linear).
    s = 1.0 / (C ** 0.5)
    wq = jax.random.uniform(kq, (C, C), minval=-s, maxval=s, dtype=jnp.float32)
    wk = jax.random.uniform(kk, (C, C), minval=-s, maxval=s, dtype=jnp.float32)
    wv = jax.random.uniform(kv, (C, C), minval=-s, maxval=s, dtype=jnp.float32)
    wproj = jax.random.uniform(kp, (C, C), minval=-s, maxval=s, dtype=jnp.float32)
    bproj = jax.random.uniform(kb, (C,), minval=-s, maxval=s, dtype=jnp.float32)

    out = multihead_attention(x, wq, wk, wv, wproj, bproj, n_heads=n_heads)
    out = jax.block_until_ready(out)

    ref = _reference(x, wq, wk, wv, wproj, bproj, n_heads=n_heads)
    assert out.shape == (B, T, C)
    # Tolerance loosened vs fp32: kernel uses bf16 matmuls + approx reciprocal.
    assert jnp.allclose(out, ref, atol=3e-2, rtol=3e-2), (
        "mismatch vs reference, max abs diff = %f" % float(jnp.max(jnp.abs(out - ref))))
    print("KERNEL_OK")
</pallas_src>

<mosaic_0001>
module attributes {stable_mosaic.version = 11 : i64} {
  func.func @_mha_head_kernel(%arg0: i32, %arg1: i32, %arg2: memref<1x8x32xbf16, #tpu.memory_space<vmem>>, %arg3: memref<4x32x8xbf16, #tpu.memory_space<vmem>>, %arg4: memref<4x32x8xbf16, #tpu.memory_space<vmem>>, %arg5: memref<4x32x8xbf16, #tpu.memory_space<vmem>>, %arg6: memref<4x8x32xbf16, #tpu.memory_space<vmem>>, %arg7: memref<1x32xf32, #tpu.memory_space<vmem>>, %arg8: memref<1x8x32xf32, #tpu.memory_space<vmem>>) attributes {dimension_semantics = [#tpu.dimension_semantics<parallel>, #tpu.dimension_semantics<arbitrary>], iteration_bounds = array<i64: 2, 4>, scalar_prefetch = 0 : i64, scratch_operands = 0 : i64, tpu.core_type = #tpu.core_type<tc>, window_params = [{transform_indices = @transform_0, window_bounds = array<i64: 1, 8, 32>}, {pipeline_mode = #tpu.pipeline_mode<synchronous>, transform_indices = @transform_1, window_bounds = array<i64: 4, 32, 8>}, {pipeline_mode = #tpu.pipeline_mode<synchronous>, transform_indices = @transform_2, window_bounds = array<i64: 4, 32, 8>}, {pipeline_mode = #tpu.pipeline_mode<synchronous>, transform_indices = @transform_3, window_bounds = array<i64: 4, 32, 8>}, {pipeline_mode = #tpu.pipeline_mode<synchronous>, transform_indices = @transform_4, window_bounds = array<i64: 4, 8, 32>}, {pipeline_mode = #tpu.pipeline_mode<synchronous>, transform_indices = @transform_5, window_bounds = array<i64: 1, 32>}, {transform_indices = @transform_6, window_bounds = array<i64: 1, 8, 32>}]} {
    %c0 = arith.constant 0 : index
    %c0_0 = arith.constant 0 : index
    %c0_1 = arith.constant 0 : index
    %0 = vector.load %arg2[%c0, %c0_0, %c0_1] : memref<1x8x32xbf16, #tpu.memory_space<vmem>>, vector<1x8x32xbf16>
    %1 = vector.shape_cast %0 : vector<1x8x32xbf16> to vector<8x32xbf16>
    %2 = arith.index_cast %arg1 : i32 to index
    %c0_2 = arith.constant 0 : index
    %c0_3 = arith.constant 0 : index
    %3 = vector.load %arg3[%2, %c0_2, %c0_3] : memref<4x32x8xbf16, #tpu.memory_space<vmem>>, vector<1x32x8xbf16>
    %4 = vector.shape_cast %3 : vector<1x32x8xbf16> to vector<32x8xbf16>
    %5 = arith.index_cast %arg1 : i32 to index
    %c0_4 = arith.constant 0 : index
    %c0_5 = arith.constant 0 : index
    %6 = vector.load %arg4[%5, %c0_4, %c0_5] : memref<4x32x8xbf16, #tpu.memory_space<vmem>>, vector<1x32x8xbf16>
    %7 = vector.shape_cast %6 : vector<1x32x8xbf16> to vector<32x8xbf16>
    %8 = arith.index_cast %arg1 : i32 to index
    %c0_6 = arith.constant 0 : index
    %c0_7 = arith.constant 0 : index
    %9 = vector.load %arg5[%8, %c0_6, %c0_7] : memref<4x32x8xbf16, #tpu.memory_space<vmem>>, vector<1x32x8xbf16>
    %10 = vector.shape_cast %9 : vector<1x32x8xbf16> to vector<32x8xbf16>
    %11 = arith.index_cast %arg1 : i32 to index
    %c0_8 = arith.constant 0 : index
    %c0_9 = arith.constant 0 : index
    %12 = vector.load %arg6[%11, %c0_8, %c0_9] : memref<4x8x32xbf16, #tpu.memory_space<vmem>>, vector<1x8x32xbf16>
    %13 = vector.shape_cast %12 : vector<1x8x32xbf16> to vector<8x32xbf16>
    %cst = arith.constant dense<0.000000e+00> : vector<8x8xf32>
    %14 = tpu.matmul %1, %4, %cst {dimension_numbers = #tpu.dot_dimension_numbers<[1], [0], [0], [1], [0, 0, 1, 1], [], []>} : vector<8x32xbf16>, vector<32x8xbf16>, vector<8x8xf32> -> vector<8x8xf32>
    %15 = arith.truncf %14 : vector<8x8xf32> to vector<8x8xbf16>
    %cst_10 = arith.constant dense<0.000000e+00> : vector<8x8xf32>
    %16 = tpu.matmul %1, %7, %cst_10 {dimension_numbers = #tpu.dot_dimension_numbers<[1], [0], [0], [1], [0, 0, 1, 1], [], []>} : vector<8x32xbf16>, vector<32x8xbf16>, vector<8x8xf32> -> vector<8x8xf32>
    %17 = arith.truncf %16 : vector<8x8xf32> to vector<8x8xbf16>
    %cst_11 = arith.constant dense<0.000000e+00> : vector<8x8xf32>
    %18 = tpu.matmul %1, %10, %cst_11 {dimension_numbers = #tpu.dot_dimension_numbers<[1], [0], [0], [1], [0, 0, 1, 1], [], []>} : vector<8x32xbf16>, vector<32x8xbf16>, vector<8x8xf32> -> vector<8x8xf32>
    %19 = arith.truncf %18 : vector<8x8xf32> to vector<8x8xbf16>
    %cst_12 = arith.constant dense<0.000000e+00> : vector<8x8xf32>
    %20 = tpu.matmul %15, %17, %cst_12 {dimension_numbers = #tpu.dot_dimension_numbers<[1], [1], [0], [0], [0, 0, 1, 0], [], []>} : vector<8x8xbf16>, vector<8x8xbf16>, vector<8x8xf32> -> vector<8x8xf32>
    %21 = tpu.iota {dimensions = array<i32: 0>} : vector<8x8xi32>
    %22 = tpu.iota {dimensions = array<i32: 1>} : vector<8x8xi32>
    %23 = arith.cmpi sge, %21, %22 : vector<8x8xi32>
    %cst_13 = arith.constant -1.000000e+30 : f32
    %24 = vector.broadcast %cst_13 : f32 to vector<8x8xf32>
    %25 = arith.select %23, %20, %24 : vector<8x8xi1>, vector<8x8xf32>
    %cst_14 = arith.constant dense<0xFF800000> : vector<8xf32>
    %26 = vector.multi_reduction <maximumf>, %25, %cst_14 [1] : vector<8x8xf32> to vector<8xf32>
    %27 = vector.shape_cast %26 : vector<8xf32> to vector<8x1xf32>
    %28 = vector.broadcast %27 : vector<8x1xf32> to vector<8x8xf32>
    %29 = arith.subf %25, %28 : vector<8x8xf32>
    %30 = math.exp %29 : vector<8x8xf32>
    %cst_15 = arith.constant dense<0.000000e+00> : vector<8xf32>
    %31 = vector.multi_reduction <add>, %30, %cst_15 [1] : vector<8x8xf32> to vector<8xf32>
    %32 = vector.shape_cast %31 : vector<8xf32> to vector<8x1xf32>
    %33 = arith.truncf %30 : vector<8x8xf32> to vector<8x8xbf16>
    %cst_16 = arith.constant dense<0.000000e+00> : vector<8x8xf32>
    %34 = tpu.matmul %33, %19, %cst_16 {dimension_numbers = #tpu.dot_dimension_numbers<[1], [0], [0], [1], [0, 0, 1, 1], [], []>} : vector<8x8xbf16>, vector<8x8xbf16>, vector<8x8xf32> -> vector<8x8xf32>
    %35 = tpu.reciprocal %32 {approx = true} : vector<8x1xf32> -> vector<8x1xf32>
    %36 = vector.broadcast %35 : vector<8x1xf32> to vector<8x8xf32>
    %37 = arith.mulf %34, %36 : vector<8x8xf32>
    %38 = arith.truncf %37 : vector<8x8xf32> to vector<8x8xbf16>
    %cst_17 = arith.constant dense<0.000000e+00> : vector<8x32xf32>
    %39 = tpu.matmul %38, %13, %cst_17 {dimension_numbers = #tpu.dot_dimension_numbers<[1], [0], [0], [1], [0, 0, 1, 1], [], []>} : vector<8x8xbf16>, vector<8x32xbf16>, vector<8x32xf32> -> vector<8x32xf32>
    %c0_i32 = arith.constant 0 : i32
    %40 = arith.cmpi eq, %arg1, %c0_i32 : i32
    %41 = arith.extui %40 : i1 to i32
    %c0_i32_18 = arith.constant 0 : i32
    %42 = arith.cmpi ne, %41, %c0_i32_18 : i32
    scf.if %42 {
      %c0_25 = arith.constant 0 : index
      %c0_26 = arith.constant 0 : index
      %49 = vector.load %arg7[%c0_25, %c0_26] : memref<1x32xf32, #tpu.memory_space<vmem>>, vector<1x32xf32>
      %50 = vector.shape_cast %49 : vector<1x32xf32> to vector<1x32xf32>
      %51 = vector.broadcast %50 : vector<1x32xf32> to vector<8x32xf32>
      %c0_27 = arith.constant 0 : index
      %c0_28 = arith.constant 0 : index
      %c0_29 = arith.constant 0 : index
      %52 = vector.load %arg8[%c0_27, %c0_28, %c0_29] : memref<1x8x32xf32, #tpu.memory_space<vmem>>, vector<1x8x32xf32>
      %53 = vector.shape_cast %52 : vector<1x8x32xf32> to vector<8x32xf32>
      %54 = vector.shape_cast %51 : vector<8x32xf32> to vector<1x8x32xf32>
      tpu.vector_store %arg8[%c0_27, %c0_28, %c0_29], %54 {strides = array<i32>} : memref<1x8x32xf32, #tpu.memory_space<vmem>>, vector<1x8x32xf32>,
    } else {
    }
    %c0_19 = arith.constant 0 : index
    %c0_20 = arith.constant 0 : index
    %c0_21 = arith.constant 0 : index
    %43 = vector.load %arg8[%c0_19, %c0_20, %c0_21] : memref<1x8x32xf32, #tpu.memory_space<vmem>>, vector<1x8x32xf32>
    %44 = vector.shape_cast %43 : vector<1x8x32xf32> to vector<8x32xf32>
    %45 = arith.addf %44, %39 : vector<8x32xf32>
    %c0_22 = arith.constant 0 : index
    %c0_23 = arith.constant 0 : index
    %c0_24 = arith.constant 0 : index
    %46 = vector.load %arg8[%c0_22, %c0_23, %c0_24] : memref<1x8x32xf32, #tpu.memory_space<vmem>>, vector<1x8x32xf32>
    %47 = vector.shape_cast %46 : vector<1x8x32xf32> to vector<8x32xf32>
    %48 = vector.shape_cast %45 : vector<8x32xf32> to vector<1x8x32xf32>
    tpu.vector_store %arg8[%c0_22, %c0_23, %c0_24], %48 {strides = array<i32>} : memref<1x8x32xf32, #tpu.memory_space<vmem>>, vector<1x8x32xf32>,
    return
  }
  func.func @transform_0(%arg0: i32, %arg1: i32) -> (i32, i32, i32) {
    %c0_i32 = arith.constant 0 : i32
    %c0_i32_0 = arith.constant 0 : i32
    %c0_i32_1 = arith.constant 0 : i32
    return %arg0, %c0_i32, %c0_i32_0 : i32, i32, i32
  }
  func.func @transform_1(%arg0: i32, %arg1: i32) -> (i32, i32, i32) {
    %c0_i32 = arith.constant 0 : i32
    %c0_i32_0 = arith.constant 0 : i32
    %c0_i32_1 = arith.constant 0 : i32
    %c0_i32_2 = arith.constant 0 : i32
    return %c0_i32, %c0_i32_0, %c0_i32_1 : i32, i32, i32
  }
  func.func @transform_2(%arg0: i32, %arg1: i32) -> (i32, i32, i32) {
    %c0_i32 = arith.constant 0 : i32
    %c0_i32_0 = arith.constant 0 : i32
    %c0_i32_1 = arith.constant 0 : i32
    %c0_i32_2 = arith.constant 0 : i32
    return %c0_i32, %c0_i32_0, %c0_i32_1 : i32, i32, i32
  }
  func.func @transform_3(%arg0: i32, %arg1: i32) -> (i32, i32, i32) {
    %c0_i32 = arith.constant 0 : i32
    %c0_i32_0 = arith.constant 0 : i32
    %c0_i32_1 = arith.constant 0 : i32
    %c0_i32_2 = arith.constant 0 : i32
    return %c0_i32, %c0_i32_0, %c0_i32_1 : i32, i32, i32
  }
  func.func @transform_4(%arg0: i32, %arg1: i32) -> (i32, i32, i32) {
    %c0_i32 = arith.constant 0 : i32
    %c0_i32_0 = arith.constant 0 : i32
    %c0_i32_1 = arith.constant 0 : i32
    %c0_i32_2 = arith.constant 0 : i32
    return %c0_i32, %c0_i32_0, %c0_i32_1 : i32, i32, i32
  }
  func.func @transform_5(%arg0: i32, %arg1: i32) -> (i32, i32) {
    %c0_i32 = arith.constant 0 : i32
    %c0_i32_0 = arith.constant 0 : i32
    %c0_i32_1 = arith.constant 0 : i32
    return %c0_i32, %c0_i32_0 : i32, i32
  }
  func.func @transform_6(%arg0: i32, %arg1: i32) -> (i32, i32, i32) {
    %c0_i32 = arith.constant 0 : i32
    %c0_i32_0 = arith.constant 0 : i32
    %c0_i32_1 = arith.constant 0 : i32
    return %arg0, %c0_i32, %c0_i32_0 : i32, i32, i32
  }
}

</mosaic_0001>

<bundles_post_ra>
// kernel: tpu_custom_call.1
= control target key start
LH: loop header
LB: loop body
LE: loop exit
PB: predicated region body
PF: predicated region fallthrough
CT: control target
= control target key end

     0   :  { %s1195_s0 = inlined_call_operand.vmem [shape: bf16[2,8,32], index: 0, kind: input, shape index: {}]   ;;  %s1196_s1 = inlined_call_operand.vmem [shape: bf16[4,32,8], index: 1, kind: input, shape index: {}]   ;;  %s1197_s2 = inlined_call_operand.vmem [shape: bf16[4,32,8], index: 2, kind: input, shape index: {}]   ;;  %s1198_s3 = inlined_call_operand.vmem [shape: bf16[4,32,8], index: 3, kind: input, shape index: {}]   ;;  %s1199_s4 = inlined_call_operand.vmem [shape: bf16[4,8,32], index: 4, kind: input, shape index: {}]   ;;  %s1200_s5 = inlined_call_operand.vmem [shape: f32[1,32], index: 5, kind: input, shape index: {}]   ;;  %s1201_s6 = inlined_call_operand.hbm [shape: f32[2,8,32], index: 6, kind: output, shape index: {}]  }
   0x1   :  { %1203 = sst [smem:[#allocation5_spill]] %s1196_s1 }
   0x2   :  { %11 = vsyncpa [#allocation3], 0 }
   0x3   :  { %13 = vsyncpa [#allocation3 + $0x1], 0  ;;  %s1019_s21 = smov 0   ;;  %s1021_s22 = smov 0  }
   0x4   :  { %s1023_s23 = smov 0   ;;  %s1025_s24 = smov 0  }
   0x5   :  { %s1027_s25 = smov 0   ;;  %s1029_s26 = smov 0  }
   0x6   :  { %s1031_s27 = smov 0   ;;  %s1033_s28 = smov 0  }
   0x7 LB: > { %s712_s29 = sadd.s32 4294967295, %s979_s28   ;;  %s713_s30 = sadd.s32 4294967294, %s979_s28   ;;  %s979_s28 = sphi %s1033_s28, %s19_s28   ;;  %s975_s27 = sphi %s1031_s27, %s1214_s27   ;;  %s971_s26 = sphi %s1029_s26, %s1213_s26   ;;  %s967_s25 = sphi %s1027_s25, %s1212_s25   ;;  %s963_s24 = sphi %s1025_s24, %s1211_s24   ;;  %s959_s23 = sphi %s1023_s23, %s1210_s23   ;;  %s955_s22 = sphi %s1021_s22, %s1209_s22   ;;  %s951_s21 = sphi %s1019_s21, %s1208_s21  }
   0x8   : > { %s28_s7 = sadd.s32 1, %s971_s26  ;;  %s31_s8 = sadd.s32 1, %s975_s27 }
   0x9   : > { %p29_p0 = scmp.ge.s32.totalorder %s28_s7, 4  ;;  %p179_p1 = scmp.ne.s32.totalorder %s959_s23, %s955_s22 }
   0xa   : > { %p180_p2 = scmp.eq.s32.totalorder %s712_s29, 7  ;;  %p185_p4 = scmp.ne.s32.totalorder %s955_s22, %s951_s21 }
   0xb   : > { %s1216_s7 = smov (%p29_p0, %s28_s7), 0  ;;  %s1218_s8 = smov (!%p29_p0, %s31_s8), %s975_s27 }
   0xc   : > { %p1068_p3 = por %p180_p2, %p179_p1  ;;  %p33_p5 = scmp.ge.s32.totalorder %s1218_s8, 2 }
   0xd   : > { %p186_p6 = scmp.eq.s32.totalorder %s713_s30, 7  ;;  %p716_p7 = scmp.ge.s32.totalorder %s979_s28, 1 }
   0xe   : > { %p226_p8 = scmp.lt.s32.totalorder %s979_s28, 9  ;;  %s1220_s8 = smov (%p33_p5, %s1218_s8), 0 }
   0xf   : > { %p1078_p9 = por %p186_p6, %p185_p4  ;;  %s166_s11 = ssub.s32 %s975_s27, %s1220_s8 }
  0x10   : > { %p227_p10 = pnand %p716_p7, %p226_p8  ;;  %s169_s12 = sadd.s32 1, %s959_s23 }
  0x11   : > { %p167_p11 = scmp.eq.s32.totalorder %s166_s11, 0  ;;  %s742_s14 = sshll.u32 (!%p227_p10), %s963_s24, 4  ;;  %v981_v0 = vmov (!%p227_p10), 0.0   ;;  %vm982_vm0 = vmmov (!%p227_p10), 0   ;;  %vm295_vm1 = vcmask (!%p227_p10), 261120   ;;  %vm446_vm2 = vcmask (!%p227_p10), 64512  }
  0x12   : > { %230 = sbr.rel (%p227_p10) target bundleno = 1081 (0x439), region = 44  ;;  %s1202_s15 = sand.u32 (!%p227_p10), 1, %s955_s22   ;;  %768 = vmatprep.subr.bf16.mxu1 (!%p227_p10), %v981_v0  ;;  %760 = vmatprep.subr.bf16.mxu0 (!%p227_p10), %v981_v0  ;;  %v493_v19 = vlaneseq (!%p227_p10)  ;;  %vm512_vm4 = vcmask (!%p227_p10), 1043456  }
  0x13   : > { %s1086_s13 = scalar_select %p167_p11, %s959_s23, %s169_s12  }
  0x14   : > { %s269_s18 = scalar_lea.vmem (!%p227_p10), %s1197_s2, %s742_s14  ;;  %s1095_s19 = sshll.u32 (!%p227_p10), %s1202_s15, 3  ;;  %772 = vmatprep.mubr.msk.bf16.mxu1 (!%p227_p10), %vm982_vm0, %v981_v0  ;;  %764 = vmatprep.mubr.msk.bf16.mxu0 (!%p227_p10), %vm982_vm0, %v981_v0  ;;  %v494_v20 = vshrl.u32 (!%p227_p10), %v493_v19, 7  ;;  %v496_v21 = vand.u32 (!%p227_p10), 127, %v493_v19 }
  0x15   : > { %v875_v1 = vld [vmem:[%s269_s18] sm:$0xff] (!%p227_p10)   ;;  %s1206_s1 = sld [smem:[#allocation5_spill]] (!%p227_p10)  ;;  %v876_v2 = vld [vmem:[%s269_s18 + $0x8] sm:$0xff] (!%p227_p10)   ;;  %p255_p12 = scmp.lt.s32.totalorder (!%p227_p10), %s967_s25, 1 }
  0x16   : > { %769 = vmatpush3.bf16.msra.mxu1 (!%p227_p10), %v875_v1  ;;  %s275_s16 = scalar_lea.vmem (!%p227_p10), %s1198_s3, %s742_s14  ;;  %vm497_vm3 = vcmp.ge.s32.totalorder (!%p227_p10), %v494_v20, %v496_v21  ;;  %p736_p13 = scmp.ne.s32.totalorder (!%p227_p10), %s963_s24, 0 }
  0x17   : > { %770 = vmatprep.subr.bf16.mxu1 (!%p227_p10), %v981_v0  ;;  %v879_v6 = vld [vmem:[%s275_s16] sm:$0xff] (!%p227_p10)   ;;  %v880_v7 = vld [vmem:[%s275_s16 + $0x8] sm:$0xff] (!%p227_p10)  }
  0x19   : > { %s256_s17 = scalar_select %p255_p12, %s967_s25, 1 }
  0x1a   : > { %771 = vmatpush3.bf16.msra.mxu1 %v876_v2  ;;  %v737_v54 = vld [vmem:[%s1200_s5] ss:$0 sm:$0xff] (!%p736_p13) }
  0x1b   : > { %s263_s30 = scalar_lea.vmem %s1206_s1, %s742_s14  ;;  %s718_s20 = sshll.u32 %s256_s17, 2  ;;  %784 = vmatprep.subr.bf16.mxu1 %v981_v0 }
  0x1c   : > { %v877_v3 = vld [vmem:[%s263_s30] sm:$0xff]   ;;  %v878_v4 = vld [vmem:[%s263_s30 + $0x8] sm:$0xff]   ;;  %s258_s1 = scalar_lea.vmem %s1195_s0, %s718_s20  ;;  %s254_s30 = scalar_lea.vmem [#allocation2], %s1095_s19 }
  0x1d   : > { %761 = vmatpush3.bf16.msra.mxu0 %v877_v3  ;;  %v260_v5 = vld [vmem:[%s258_s1] sm:$0xf]  ;;  %s723_s1 = sshll.u32 %s963_s24, 2  ;;  %616 = vst.msk [vmem:[%s254_s30] sm:$0xff] (!%p736_p13), %vm295_vm1, %v737_v54 }
  0x1e   : > { %762 = vmatprep.subr.bf16.mxu0 %v981_v0  ;;  %773 = vmatmul.mubr.msk.bf16.vlgmr.msra.gmra.mrb[0].mxu1 %vm295_vm1, %v260_v5  ;;  %s281_s18 = scalar_lea.vmem %s1199_s4, %s723_s1 }
  0x1f   : > { %786 = vmatprep.mubr.msk.bf16.mxu1 %vm982_vm0, %v981_v0  ;;  %v282_v40 = vld [vmem:[%s281_s18] sm:$0xf] }
  0x20   : > { %v563_v41 = vsel %vm512_vm4, %v282_v40, 0 }
  0x21   : > { %763 = vmatpush3.bf16.msra.mxu0 %v878_v4 }
  0x22   : > { %776 = vmatprep.subr.bf16.mxu0 %v981_v0 }
  0x24   : > { %765 = vmatmul.mubr.msk.bf16.vlgmr.msra.gmra.mrb[0].mxu0 %vm295_vm1, %v260_v5 }
  0x25   : > { %780 = vmatprep.mubr.msk.bf16.mxu0 %vm982_vm0, %v981_v0  ;;  %777 = vmatpush3.bf16.msra.mxu0 %v879_v6 }
  0x26   : > { %778 = vmatprep.subr.bf16.mxu0 %v981_v0 }
  0x29   : > { %779 = vmatpush3.bf16.msra.mxu0 %v880_v7 }
  0x2a   : > { %790 = vmatprep.subr.bf16.mxu0 %v981_v0 }
  0x2c   : > { %781 = vmatmul.mubr.msk.bf16.vlgmr.msra.gmra.mrb[4].mxu0 %vm295_vm1, %v260_v5 }
  0x2d   : > { %792 = vmatprep.mubr.msk.bf16.mxu0 %vm982_vm0, %v981_v0 }
  0xf1   : > { %v386_v8 = vpop.f32.mrb[0].mxu1 }
  0xf2   : > { %v392_v9 = vpack.c.bf16 %v386_v8, %v386_v8  ;;  %v774_v10 = vpop.f32.mrb[1].mxu1 }
  0xf3   : > { %v389_v11 = vpop.f32.mrb[2].mxu1 }
  0xf4   : > { %v451_v13 = vsel %vm446_vm2, %v392_v9, 0  ;;  %v775_v14 = vpop.f32.mrb[3].mxu1 }
  0xf5   : > { %785 = vmatpush3.bf16.xpose.msra.mxu1 %v451_v13 }
  0xf6   : > { %796 = vmatprep.subr.bf16.mxu1 %v981_v0 }
  0xf7   : > { %v333_v12 = vpop.f32.mrb[0].mxu0 }
  0xf8   : > { %v766_v15 = vpop.f32.mrb[1].mxu0  ;;  %v339_v18 = vpack.c.bf16 %v333_v12, %v333_v12 }
  0xf9   : > { %v336_v16 = vpop.f32.mrb[2].mxu0 }
  0xfa   : > { %v767_v17 = vpop.f32.mrb[3].mxu0 }
  0xfc   : > { %787 = vmatmul.mubr.msk.bf16.vlgmr.msra.gmra.mrb[4].mxu1 %vm446_vm2, %v339_v18 }
  0xfd   : > { %798 = vmatprep.mubr.msk.bf16.mxu1 %vm982_vm0, %v981_v0  ;;  %797 = vmatpush3.bf16.msra.mxu1 %v563_v41 }
  0xff   : > { %v439_v28 = vpop.f32.mrb[4].mxu0 }
 0x100   : > { %v445_v29 = vpack.c.bf16 %v439_v28, %v439_v28  ;;  %v782_v30 = vpop.f32.mrb[5].mxu0 }
 0x101   : > { %v442_v31 = vpop.f32.mrb[6].mxu0 }
 0x102   : > { %v514_v32 = vsel %vm512_vm4, %v445_v29, 0  ;;  %v783_v33 = vpop.f32.mrb[7].mxu0 }
 0x103   : > { %791 = vmatpush3.bf16.msra.mxu0 %v514_v32 }
 0x1cf   : > { %v487_v22 = vpop.f32.mrb[4].mxu1 }
 0x1d0   : > { %v498_v23 = vsel %vm497_vm3, %v487_v22, -1e+30  ;;  %v788_v24 = vpop.f32.mrb[5].mxu1 }
 0x1d1   : > { %v490_v25 = vpop.f32.mrb[6].mxu1  ;;  %v499_v26 = vsel %vm446_vm2, %v498_v23, -inf }
 0x1d2   : > { %500 = vmax.xlane.f32.xlu0 %v499_v26  ;;  %v789_v27 = vpop.f32.mrb[7].mxu1 }
 0x25f   : > { %v501_v34 = vpop.xlane.xlu0 %500 }
 0x260   : > { %v502_v35 = vsub.f32 %v498_v23, %v501_v34 }
 0x262   : > { %v503_v36 = vmul.f32 1.442695, %v502_v35 }
 0x264   : > { %881 = vpow2.f32 %v503_v36 }
 0x26e   : > { %v882_v37 = vpop.eup %881 }
 0x26f   : > { %v505_v38 = vsel %vm446_vm2, %v882_v37, 0.0  ;;  %v508_v39 = vpack.c.bf16 %v882_v37, %v882_v37 }
 0x270   : > { %506 = vadd.xlane.f32.xlu0 %v505_v38 }
 0x271   : > { %793 = vmatmul.mubr.msk.bf16.vlgmr.msra.gmra.mrb[8].mxu0 %vm446_vm2, %v508_v39 }
 0x2fd   : > { %v507_v42 = vpop.xlane.xlu0 %506 }
 0x2fe   : > { %883 = vrcp.f32 %v507_v42 }
 0x308   : > { %v884_v43 = vpop.eup %883 }
 0x344   : > { %v550_v44 = vpop.f32.mrb[8].mxu0 }
 0x345   : > { %v557_v45 = vmul.f32 %v884_v43, %v550_v44  ;;  %v794_v46 = vpop.f32.mrb[9].mxu0 }
 0x346   : > { %v553_v47 = vpop.f32.mrb[10].mxu0 }
 0x347   : > { %v558_v48 = vpack.c.bf16 %v557_v45, %v557_v45  ;;  %v795_v49 = vpop.f32.mrb[11].mxu0 }
 0x349   : > { %799 = vmatmul.mubr.msk.bf16.vlgmr.msra.gmra.mrb[8].mxu1 %vm446_vm2, %v558_v48 }
 0x419   : > { %608 = sbr.rel (%p736_p13) target bundleno = 1056 (0x420), region = 48 }
 0x41c   : > { %v599_v50 = vpop.f32.mrb[8].mxu1 }
 0x41d   : > { %v800_v51 = vpop.f32.mrb[9].mxu1 }
 0x41e   : > { %v602_v52 = vpop.f32.mrb[10].mxu1 }
 0x41f   : > { %v801_v53 = vpop.f32.mrb[11].mxu1 }
 0x420 PF: > { %v617_v55 = vld [vmem:[%s254_s30] sm:$0xff]  ;;  %s739_s16 = sshll.u32 %s967_s25, 7  ;;  %s634_s24 = sshll.u32 %s254_s30, 4  ;;  %s1141_s24 = int_to_ptr.vmem [resolvable:$true] %s634_s24 }
 0x421   : > { %v618_v56 = vadd.f32 %v617_v55, %v599_v50  ;;  %s1139_s19 = scalar_lea.hbm %s1201_s6, %s739_s16  ;;  %s1207_s29 = sand.u32 1, %s955_s22  }
 0x422   : > { %s621_s1 = scalar_lea.sflag [#allocation3], %s1207_s29  ;;  %s885_s14 = scalar_lea.vmem %s1141_s24, 128 }
 0x423   : > { %619 = vst.msk [vmem:[%s254_s30] sm:$0xff] %vm295_vm1, %v618_v56  ;;  %p886_p0 = scmp.ne.s32.totalorder %s1141_s24, %s885_s14  ;;  %s983_s25 = smov [#allocation2]  }
 0x424   : > { %s889_s15 = sshll.u32 %s983_s25, 4  ;;  %s890_s15 = int_to_ptr.vmem [resolvable:$false] %s889_s15 }
 0x425   : > { %p887_p1 = pnand %p886_p0, %p1068_p3  ;;  %s891_s18 = scalar_lea.vmem %s890_s15, 256 }
 0x426   : > { %p892_p4 = scmp.lt.s32.totalorder %s1141_s24, %s890_s15  ;;  %p893_p5 = scmp.lt.s32.totalorder %s891_s18, %s885_s14 }
 0x427   : > { %p888_p2 = pneg %p887_p1 }
 0x428   : > { %p894_p6 = por %p893_p5, %p892_p4 }
 0x42a   : > { %p895_p7 = pnand %p894_p6, %p888_p2 }
 0x42c   : > { %898 = shalt.err (!%p895_p7)
}
 0x42d   : > { %s899_s30 = scalar_lea.hbm %s1139_s19, 128  ;;  %s903_s16 = scalar_lea.hbm %s1201_s6, 256 }
 0x42e   : > { %p900_p8 = scmp.ne.s32.totalorder %s1139_s19, %s899_s30  ;;  %p904_p12 = scmp.lt.u32.totalorder %s1139_s19, %s1201_s6 }
 0x42f   : > { %p905_p13 = scmp.lt.u32.totalorder %s903_s16, %s899_s30  ;;  %p907_p1 = scmp.lt.u32.totalorder %s899_s30, %s1139_s19 }
 0x430   : > { %p901_p10 = pnand %p900_p8, %p1068_p3 }
 0x431   : > { %p906_p0 = por %p905_p13, %p904_p12 }
 0x432   : > { %p902_p11 = pneg %p901_p10 }
 0x433   : > { %p908_p2 = por %p907_p1, %p906_p0 }
 0x435   : > { %p909_p4 = pnand %p908_p2, %p902_p11 }
 0x437   : > { %912 = shalt.err (!%p909_p4)
}
 0x438   : > { %802 = dma.vmem_to_hbm [thread:$0]  (%p1068_p3), %s1141_s24, 128, %s1139_s19, %s621_s1  }
 0x439 PF: > { %p808_p5 = scmp.ge.s32.totalorder %s979_s28, 2  ;;  %s646_s29 = sand.u32 1, %s951_s21  }
 0x43a   : > { %s647_s14 = scalar_lea.sflag [#allocation3], %s646_s29 }
 0x43b   : > { %p805_p6 = pnand %p808_p5, %p1078_p9 }
 0x43d   : > { %946 = dma.done.wait (!%p805_p6), %s647_s14, 128  }
 0x43e   : > { %948 = vsyncadd (!%p805_p6), %s647_s14, 4294967168  ;;  %s19_s28 = sadd.s32 1, %s979_s28   ;;  %s1208_s21 = smov %s955_s22 }
 0x43f   : > { %p16_p7 = scmp.ge.s32.totalorder %s19_s28, 10   ;;  %s1209_s22 = smov %s959_s23 }
 0x440   : > { %s1210_s23 = smov %s1086_s13  ;;  %s1211_s24 = smov %s971_s26 }
 0x441   : > { %s1212_s25 = smov %s975_s27  ;;  %s1213_s26 = smov %s1216_s7 }
 0x442   : > { %s1214_s27 = smov %s1220_s8  ;;  %18 = sbr.rel (!%p16_p7) target bundleno = 7 (0x7), region = 87 }
 0x449   :  { %652 = vsyncpa [#allocation3], 1 }
 0x44a   :  { %654 = vsyncpa [#allocation3 + $0x1], 1 }

</bundles_post_ra>
